<compile_context>
chip_gen: v5e
topology: v5e:2x2
jax: 0.10.0
libtpu: 0.0.40
codegen_flags: <defaults>
</compile_context>

<pallas_src>
import functools

import jax
import jax.numpy as jnp
from jax.experimental import pallas as pl
from jax.experimental.pallas import tpu as pltpu


def _round_up(x: int, m: int) -> int:
    return ((x + m - 1) // m) * m


def _qnetwork_kernel(x_ref, w1t_ref, b1_ref, w2t_ref, b2_ref, w3_ref, b3_ref,
                     o_ref, *, chunk, compute_dtype):
    """Fused 3-layer MLP on one batch tile.

    x_ref  : (tb, D)    natural-layout input tile (batch rows, features last)
    w1t    : (H, D)     fc1 weight, PyTorch (out, in) layout
    b1     : (H, 1)
    w2t    : (H3p, H)   fc2 weight (rows zero-padded 21 -> 24)
    b2     : (H3p, 1)
    w3     : (H3p, 1)   output-layer weight as a column
    b3     : (1, 1)     scalar bias, lives in SMEM
    o_ref  : (1, tb)    Q-values for this tile, lane-dense
    """
    # Weights/biases loaded once per grid step (tiny), reused by every chunk.
    w1t = w1t_ref[...].astype(compute_dtype)          # (H, D)
    b1 = b1_ref[...]                                  # (H, 1)  f32
    w2t = w2t_ref[...].astype(compute_dtype)          # (H3p, H)
    b2 = b2_ref[...]                                  # (H3p, 1) f32
    w3 = w3_ref[...]                                  # (H3p, 1) f32
    b3 = b3_ref[0, 0]                                 # scalar (SMEM)

    num_chunks = x_ref.shape[0] // chunk
    # Contract both operands on their last axis: (H, D) x (chunk, D) -> (H, chunk).
    # This puts the batch on the lane axis without any wrapper-side transpose.
    dn = (((1,), (1,)), ((), ()))

    def body(c, carry):
        off = pl.multiple_of(c * chunk, chunk)
        x = x_ref[pl.ds(off, chunk), :].astype(compute_dtype)        # (chunk, D)

        # fc1 + bias + ReLU (f32 accumulation on the MXU).
        h1 = jax.lax.dot_general(w1t, x, dn,
                                 preferred_element_type=jnp.float32)  # (H, chunk)
        h1 = jnp.maximum(h1 + b1, 0.0).astype(compute_dtype)

        # fc2 + bias + ReLU.
        h2 = jnp.dot(w2t, h1, preferred_element_type=jnp.float32)     # (H3p, chunk)
        h2 = jnp.maximum(h2 + b2, 0.0)

        # Output layer (H3p -> 1): VPU multiply + sublane reduce; result is
        # already lane-dense (1, chunk).
        q = jnp.sum(h2 * w3, axis=0, keepdims=True) + b3              # (1, chunk)
        o_ref[:, pl.ds(off, chunk)] = q.astype(o_ref.dtype)
        return carry

    jax.lax.fori_loop(0, num_chunks, body, 0, unroll=True)


def prepare_params(params):
    """One-time re-layout of QNetwork params into kernel form.

    Call once (e.g. at init) and pass the result to qnetwork_forward so the
    transposes / zero-pads are not re-done on every forward call.
    """
    f32 = jnp.float32
    w1 = jnp.asarray(params["w1"], f32)                       # (D, H)
    b1 = jnp.asarray(params["b1"], f32).reshape(-1)           # (H,)
    w2 = jnp.asarray(params["w2"], f32)                       # (H, H3)
    b2 = jnp.asarray(params["b2"], f32).reshape(-1)           # (H3,)
    w3 = jnp.asarray(params["w3"], f32).reshape(-1)           # (H3,)
    b3 = jnp.asarray(params["b3"], f32).reshape(1, 1)         # (1, 1)

    D, H = w1.shape
    H3 = w2.shape[1]
    H3p = _round_up(H3, 8)     # 21 -> 24, zero padded (numerically exact)

    return {
        "w1t": w1.T,                                                    # (H, D)
        "b1c": b1.reshape(H, 1),                                        # (H, 1)
        "w2t": jnp.pad(w2.T, ((0, H3p - H3), (0, 0))),                  # (H3p, H)
        "b2c": jnp.pad(b2.reshape(H3, 1), ((0, H3p - H3), (0, 0))),     # (H3p, 1)
        "w3c": jnp.pad(w3.reshape(H3, 1), ((0, H3p - H3), (0, 0))),     # (H3p, 1)
        "b3": b3,                                                       # (1, 1)
    }


def _choose_tile(B: int, block_b: int, chunk: int):
    block_b = max(128, _round_up(block_b, 128))
    chunk = max(128, _round_up(chunk, 128))
    tb = min(block_b, _round_up(B, 128))
    # v7x megacore: prefer >= 2 grid tiles when the batch allows it so the
    # "parallel" batch axis shards across both TensorCores (no-op on v5e/v6e).
    half = _round_up(-(-B // 2), 128)
    if B > 128 and tb > half:
        tb = half
    # Inner arithmetic chunk must evenly divide the tile.
    chunk = min(chunk, tb)
    while tb % chunk:
        chunk -= 128
    b_pad = _round_up(B, tb)
    return tb, chunk, b_pad


def qnetwork_forward(state_action, params, *, block_b=2048, chunk=512,
                     compute_dtype=jnp.float32):
    """Fused QNetwork forward pass on TPU.

    state_action: (B, state_dim + action_dim) array.  Pass bf16 activations
        together with compute_dtype=jnp.bfloat16 for the MXU fast path (input
        DMA is 2 B/elem); expect ~1e-2 relative accuracy on that path, not f32.
    params: either raw params {w1,b1,w2,b2,w3,b3} or the output of
        prepare_params (preferred: avoids per-call re-layout).
    returns: (B, 1) float32 Q-values.
    """
    p = params if "w1t" in params else prepare_params(params)

    B, D = state_action.shape
    H, Dw = p["w1t"].shape
    H3p = p["w2t"].shape[0]
    assert D == Dw, f"feature dim mismatch: input {D}, params {Dw}"

    tb, chunk, b_pad = _choose_tile(B, block_b, chunk)
    num_tiles = b_pad // tb

    # Only pad the batch dimension when the tile does not divide it; for the
    # common power-of-two training batches this is a no-op (no extra HBM pass).
    x_in = state_action
    if b_pad != B:
        x_in = jnp.pad(state_action, ((0, b_pad - B), (0, 0)))

    itemsize = jnp.dtype(x_in.dtype).itemsize
    cost = pl.CostEstimate(
        flops=2 * b_pad * (D * H + H * H3p + H3p),
        transcendentals=0,
        bytes_accessed=(itemsize * b_pad * D + 4 * b_pad
                        + 4 * (H * D + H + H3p * H + 3 * H3p + 1)),
    )

    out = pl.pallas_call(
        functools.partial(_qnetwork_kernel, chunk=chunk,
                          compute_dtype=compute_dtype),
        out_shape=jax.ShapeDtypeStruct((1, b_pad), jnp.float32),
        grid_spec=pltpu.PrefetchScalarGridSpec(
            num_scalar_prefetch=0,
            grid=(num_tiles,),
            in_specs=[
                # input tile: pipelined over the batch grid, natural layout
                pl.BlockSpec((tb, D), lambda i: (i, 0)),
                # weights/biases: constant index_map -> resident in VMEM
                pl.BlockSpec((H, D), lambda i: (0, 0)),
                pl.BlockSpec((H, 1), lambda i: (0, 0)),
                pl.BlockSpec((H3p, H), lambda i: (0, 0)),
                pl.BlockSpec((H3p, 1), lambda i: (0, 0)),
                pl.BlockSpec((H3p, 1), lambda i: (0, 0)),
                # scalar output bias in SMEM (no padded VMEM tile for 1 value)
                pl.BlockSpec(memory_space=pltpu.MemorySpace.SMEM),
            ],
            out_specs=pl.BlockSpec((1, tb), lambda i: (0, i)),
        ),
        compiler_params=pltpu.CompilerParams(
            dimension_semantics=("parallel",),   # v7x: shard batch over 2 TCs
        ),
        cost_estimate=cost,
    )(x_in, p["w1t"], p["b1c"], p["w2t"], p["b2c"], p["w3c"], p["b3"])

    # (1, b_pad) row-major == batch order; drop padding rows.
    return out.reshape(b_pad, 1)[:B]


def init_params(key, state_dim, action_dim, hidden_size=64):
    """Deterministic synthetic init (PyTorch-style uniform fan-in bounds)."""
    in_dim = state_dim + action_dim
    h3 = hidden_size // 3  # 64 // 3 == 21, matches nn.Linear(hidden, hidden//3)

    def linear_init(k, fan_in, fan_out):
        kw, kb = jax.random.split(k)
        bound = 1.0 / jnp.sqrt(jnp.float32(fan_in))
        w = jax.random.uniform(kw, (fan_in, fan_out), jnp.float32, -bound, bound)
        b = jax.random.uniform(kb, (1, fan_out), jnp.float32, -bound, bound)
        return w, b

    k1, k2, k3 = jax.random.split(key, 3)
    w1, b1 = linear_init(k1, in_dim, hidden_size)
    w2, b2 = linear_init(k2, hidden_size, h3)
    w3, b3 = linear_init(k3, h3, 1)
    return {"w1": w1, "b1": b1, "w2": w2, "b2": b2, "w3": w3, "b3": b3}


def qnetwork_reference(state_action, params):
    """Plain-JAX reference for correctness checking."""
    x = state_action.astype(jnp.float32)
    h1 = jnp.maximum(x @ params["w1"] + params["b1"], 0.0)
    h2 = jnp.maximum(h1 @ params["w2"] + params["b2"], 0.0)
    return h2 @ params["w3"] + params["b3"]


if __name__ == "__main__":
    key = jax.random.PRNGKey(0)
    k_params, k_x, k_x2, k_x3 = jax.random.split(key, 4)

    state_dim, action_dim, hidden_size = 6, 2, 64
    batch = 8

    params = init_params(k_params, state_dim, action_dim, hidden_size)
    prepared = prepare_params(params)   # one-time weight re-layout

    state_action = jax.random.normal(
        k_x, (batch, state_dim + action_dim), dtype=jnp.float32
    )

    # 1) Small batch, float32 path (single tile, single chunk).
    q = jax.block_until_ready(qnetwork_forward(state_action, prepared))
    q_ref = qnetwork_reference(state_action, params)
    assert q.shape == (batch, 1)
    assert jnp.allclose(q, q_ref, atol=1e-5, rtol=1e-5), "f32 mismatch vs reference"

    # 2) Ragged batch, multi-tile grid path (exercises pipelining + batch padding).
    sa_big = jax.random.normal(k_x2, (300, state_dim + action_dim), jnp.float32)
    q_big = jax.block_until_ready(qnetwork_forward(sa_big, prepared, block_b=128))
    q_big_ref = qnetwork_reference(sa_big, params)
    assert q_big.shape == (300, 1)
    assert jnp.allclose(q_big, q_big_ref, atol=1e-5, rtol=1e-5), "multi-tile mismatch"

    # 3) Multi-tile + multi-chunk inner loop (2 tiles of 512, 2 chunks of 256 each).
    sa_med = jax.random.normal(k_x3, (1024, state_dim + action_dim), jnp.float32)
    q_med = jax.block_until_ready(
        qnetwork_forward(sa_med, prepared, block_b=512, chunk=256)
    )
    q_med_ref = qnetwork_reference(sa_med, params)
    assert jnp.allclose(q_med, q_med_ref, atol=1e-5, rtol=1e-5), "chunk-loop mismatch"

    # 4) bf16 fast path: bf16 activations (half the input DMA bytes) + bf16
    #    matmul operands; f32 accumulation.  Accuracy is ~1e-2 relative.
    q_bf16 = jax.block_until_ready(
        qnetwork_forward(state_action.astype(jnp.bfloat16), prepared,
                         compute_dtype=jnp.bfloat16)
    )
    assert jnp.allclose(q_bf16, q_ref, atol=1e-1, rtol=1e-1), "bf16 path diverged"

    print("KERNEL_OK")
</pallas_src>

<mosaic_0001>
module attributes {stable_mosaic.version = 11 : i64} {
  func.func @_qnetwork_kernel(%arg0: i32, %arg1: memref<128x8xf32, #tpu.memory_space<vmem>>, %arg2: memref<64x8xf32, #tpu.memory_space<vmem>>, %arg3: memref<64x1xf32, #tpu.memory_space<vmem>>, %arg4: memref<24x64xf32, #tpu.memory_space<vmem>>, %arg5: memref<24x1xf32, #tpu.memory_space<vmem>>, %arg6: memref<24x1xf32, #tpu.memory_space<vmem>>, %arg7: memref<1x1xf32, #tpu.memory_space<smem>>, %arg8: memref<1x128xf32, #tpu.memory_space<vmem>>) attributes {dimension_semantics = [#tpu.dimension_semantics<parallel>], iteration_bounds = array<i64: 1>, scalar_prefetch = 0 : i64, scratch_operands = 0 : i64, tpu.core_type = #tpu.core_type<tc>, window_params = [{transform_indices = @transform_0, window_bounds = array<i64: 128, 8>}, {pipeline_mode = #tpu.pipeline_mode<synchronous>, transform_indices = @transform_1, window_bounds = array<i64: 64, 8>}, {pipeline_mode = #tpu.pipeline_mode<synchronous>, transform_indices = @transform_2, window_bounds = array<i64: 64, 1>}, {pipeline_mode = #tpu.pipeline_mode<synchronous>, transform_indices = @transform_3, window_bounds = array<i64: 24, 64>}, {pipeline_mode = #tpu.pipeline_mode<synchronous>, transform_indices = @transform_4, window_bounds = array<i64: 24, 1>}, {pipeline_mode = #tpu.pipeline_mode<synchronous>, transform_indices = @transform_5, window_bounds = array<i64: 24, 1>}, {transform_indices = @transform_6, window_bounds = array<i64: 1, 1>}, {transform_indices = @transform_7, window_bounds = array<i64: 1, 128>}]} {
    %c0 = arith.constant 0 : index
    %c0_0 = arith.constant 0 : index
    %0 = vector.load %arg2[%c0, %c0_0] : memref<64x8xf32, #tpu.memory_space<vmem>>, vector<64x8xf32>
    %c0_1 = arith.constant 0 : index
    %c0_2 = arith.constant 0 : index
    %1 = vector.load %arg3[%c0_1, %c0_2] : memref<64x1xf32, #tpu.memory_space<vmem>>, vector<64x1xf32>
    %c0_3 = arith.constant 0 : index
    %c0_4 = arith.constant 0 : index
    %2 = vector.load %arg4[%c0_3, %c0_4] : memref<24x64xf32, #tpu.memory_space<vmem>>, vector<24x64xf32>
    %c0_5 = arith.constant 0 : index
    %c0_6 = arith.constant 0 : index
    %3 = vector.load %arg5[%c0_5, %c0_6] : memref<24x1xf32, #tpu.memory_space<vmem>>, vector<24x1xf32>
    %c0_7 = arith.constant 0 : index
    %c0_8 = arith.constant 0 : index
    %4 = vector.load %arg6[%c0_7, %c0_8] : memref<24x1xf32, #tpu.memory_space<vmem>>, vector<24x1xf32>
    %c0_9 = arith.constant 0 : index
    %c0_10 = arith.constant 0 : index
    %5 = memref.load %arg7[%c0_9, %c0_10] : memref<1x1xf32, #tpu.memory_space<smem>>
    %c0_i32 = arith.constant 0 : i32
    %c128_i32 = arith.constant 128 : i32
    %6 = arith.muli %c0_i32, %c128_i32 : i32
    %7 = tpu.assume_multiple %6, 128 : i32
    %8 = arith.index_cast %7 : i32 to index
    %c0_11 = arith.constant 0 : index
    %9 = vector.load %arg1[%8, %c0_11] : memref<128x8xf32, #tpu.memory_space<vmem>>, vector<128x8xf32>
    %cst = arith.constant dense<0.000000e+00> : vector<64x128xf32>
    %10 = tpu.matmul %0, %9, %cst {dimension_numbers = #tpu.dot_dimension_numbers<[1], [1], [0], [0], [0, 0, 1, 0], [], []>} : vector<64x8xf32>, vector<128x8xf32>, vector<64x128xf32> -> vector<64x128xf32>
    %11 = vector.broadcast %1 : vector<64x1xf32> to vector<64x128xf32>
    %12 = arith.addf %10, %11 : vector<64x128xf32>
    %cst_12 = arith.constant 0.000000e+00 : f32
    %13 = vector.broadcast %cst_12 : f32 to vector<64x128xf32>
    %14 = arith.maximumf %12, %13 : vector<64x128xf32>
    %cst_13 = arith.constant dense<0.000000e+00> : vector<24x128xf32>
    %15 = tpu.matmul %2, %14, %cst_13 {dimension_numbers = #tpu.dot_dimension_numbers<[1], [0], [0], [1], [0, 0, 1, 1], [], []>} : vector<24x64xf32>, vector<64x128xf32>, vector<24x128xf32> -> vector<24x128xf32>
    %16 = vector.broadcast %3 : vector<24x1xf32> to vector<24x128xf32>
    %17 = arith.addf %15, %16 : vector<24x128xf32>
    %cst_14 = arith.constant 0.000000e+00 : f32
    %18 = vector.broadcast %cst_14 : f32 to vector<24x128xf32>
    %19 = arith.maximumf %17, %18 : vector<24x128xf32>
    %20 = vector.broadcast %4 : vector<24x1xf32> to vector<24x128xf32>
    %21 = arith.mulf %19, %20 : vector<24x128xf32>
    %cst_15 = arith.constant dense<0.000000e+00> : vector<128xf32>
    %22 = vector.multi_reduction <add>, %21, %cst_15 [0] : vector<24x128xf32> to vector<128xf32>
    %23 = vector.shape_cast %22 : vector<128xf32> to vector<1x128xf32>
    %24 = vector.broadcast %5 : f32 to vector<1x128xf32>
    %25 = arith.addf %23, %24 : vector<1x128xf32>
    %c0_16 = arith.constant 0 : index
    %26 = arith.index_cast %7 : i32 to index
    %27 = vector.load %arg8[%c0_16, %26] : memref<1x128xf32, #tpu.memory_space<vmem>>, vector<1x128xf32>
    tpu.vector_store %arg8[%c0_16, %26], %25 {strides = array<i32>} : memref<1x128xf32, #tpu.memory_space<vmem>>, vector<1x128xf32>,
    %c1_i32 = arith.constant 1 : i32
    return
  }
  func.func @transform_0(%arg0: i32) -> (i32, i32) {
    %c0_i32 = arith.constant 0 : i32
    %c0_i32_0 = arith.constant 0 : i32
    return %arg0, %c0_i32 : i32, i32
  }
  func.func @transform_1(%arg0: i32) -> (i32, i32) {
    %c0_i32 = arith.constant 0 : i32
    %c0_i32_0 = arith.constant 0 : i32
    %c0_i32_1 = arith.constant 0 : i32
    return %c0_i32, %c0_i32_0 : i32, i32
  }
  func.func @transform_2(%arg0: i32) -> (i32, i32) {
    %c0_i32 = arith.constant 0 : i32
    %c0_i32_0 = arith.constant 0 : i32
    %c0_i32_1 = arith.constant 0 : i32
    return %c0_i32, %c0_i32_0 : i32, i32
  }
  func.func @transform_3(%arg0: i32) -> (i32, i32) {
    %c0_i32 = arith.constant 0 : i32
    %c0_i32_0 = arith.constant 0 : i32
    %c0_i32_1 = arith.constant 0 : i32
    return %c0_i32, %c0_i32_0 : i32, i32
  }
  func.func @transform_4(%arg0: i32) -> (i32, i32) {
    %c0_i32 = arith.constant 0 : i32
    %c0_i32_0 = arith.constant 0 : i32
    %c0_i32_1 = arith.constant 0 : i32
    return %c0_i32, %c0_i32_0 : i32, i32
  }
  func.func @transform_5(%arg0: i32) -> (i32, i32) {
    %c0_i32 = arith.constant 0 : i32
    %c0_i32_0 = arith.constant 0 : i32
    %c0_i32_1 = arith.constant 0 : i32
    return %c0_i32, %c0_i32_0 : i32, i32
  }
  func.func @transform_6(%arg0: i32) -> (i32, i32) {
    %c0_i32 = arith.constant 0 : i32
    %c0_i32_0 = arith.constant 0 : i32
    %c0_i32_1 = arith.constant 0 : i32
    return %c0_i32, %c0_i32_0 : i32, i32
  }
  func.func @transform_7(%arg0: i32) -> (i32, i32) {
    %c0_i32 = arith.constant 0 : i32
    %c0_i32_0 = arith.constant 0 : i32
    return %c0_i32, %arg0 : i32, i32
  }
}

</mosaic_0001>

<bundles_post_ra>
// kernel: tpu_custom_call.1
= control target key start
LH: loop header
LB: loop body
LE: loop exit
PB: predicated region body
PF: predicated region fallthrough
CT: control target
= control target key end

     0   :  { %vm110_vm0 = vcmask 64512   ;;  %s648_s0 = inlined_call_operand.vmem [shape: f32[128,8], index: 0, kind: input, shape index: {}]   ;;  %s649_s1 = inlined_call_operand.vmem [shape: f32[64,8], index: 1, kind: input, shape index: {}]   ;;  %s650_s2 = inlined_call_operand.vmem [shape: f32[64,1], index: 2, kind: input, shape index: {}]   ;;  %s651_s3 = inlined_call_operand.vmem [shape: f32[24,64], index: 3, kind: input, shape index: {}]   ;;  %s652_s4 = inlined_call_operand.vmem [shape: f32[24,1], index: 4, kind: input, shape index: {}]   ;;  %s653_s5 = inlined_call_operand.vmem [shape: f32[24,1], index: 5, kind: input, shape index: {}]   ;;  %s654_s6 = inlined_call_operand.<no memory space> [shape: f32[1,1], index: 6, kind: input, shape index: {}]   ;;  %s655_s7 = inlined_call_operand.hbm [shape: f32[1,128], index: 7, kind: output, shape index: {}]  }
   0x1   :  { %v69_v0 = vld [vmem:[%s648_s0 + $0x78] sm:$0xff]  ;;  %v68_v1 = vld [vmem:[%s648_s0 + $0x70] sm:$0xff] }
   0x2   :  { %359 = vmatpush.xpose.msk.msra.mxu3 %vm110_vm0, %v69_v0  ;;  %358 = vmatpush.xpose.msk.msra.mxu2 %vm110_vm0, %v69_v0 }
   0x3   :  { %331 = vmatpush.xpose.msk.msra.mxu0 %vm110_vm0, %v69_v0 }
   0x4   :  { %13 = vsyncpa [#allocation4], 0  ;;  %v67_v2 = vld [vmem:[%s648_s0 + $0x68] sm:$0xff]  ;;  %v66_v3 = vld [vmem:[%s648_s0 + $0x60] sm:$0xff]  ;;  %v421_v14 = vmov 0   ;;  %vm247_vm1 = vcmask 523264  }
   0x5   :  { %v65_v4 = vld [vmem:[%s648_s0 + $0x58] sm:$0xff]  ;;  %v64_v5 = vld [vmem:[%s648_s0 + $0x50] sm:$0xff]  ;;  %v63_v6 = vld [vmem:[%s648_s0 + $0x48] sm:$0xff]  ;;  %392 = vset.pattern.permute.xlu0 %v421_v14  ;;  %393 = vset.pattern.permute.xlu1 %v421_v14  ;;  %s422_s9 = smov [#allocation3]   ;;  %s322_s13 = sshll.u32 %s655_s7, 4  ;;  %s323_s13 = int_to_ptr.hbm [resolvable:$true] %s322_s13 }
   0x6   :  { %361 = vmatpush.xpose.msk.msra.mxu3 %vm110_vm0, %v68_v1  ;;  %360 = vmatpush.xpose.msk.msra.mxu2 %vm110_vm0, %v68_v1  ;;  %v62_v7 = vld [vmem:[%s648_s0 + $0x40] sm:$0xff]  ;;  %v61_v8 = vld [vmem:[%s648_s0 + $0x38] sm:$0xff]  ;;  %v60_v9 = vld [vmem:[%s648_s0 + $0x30] sm:$0xff]  ;;  %s320_s10 = sshll.u32 %s422_s9, 4  ;;  %s321_s10 = int_to_ptr.vmem [resolvable:$true] %s320_s10 }
   0x7   :  { %332 = vmatpush.xpose.msk.msra.mxu0 %vm110_vm0, %v68_v1  ;;  %v59_v10 = vld [vmem:[%s648_s0 + $0x28] sm:$0xff]  ;;  %v43_v11 = vld [vmem:[%s650_s2 + $0x38] sm:$0xff]  ;;  %v58_v13 = vld [vmem:[%s648_s0 + $0x20] sm:$0xff]  ;;  %394 = vset.pattern.permute.xlu2 %v421_v14 }
   0x8   :  { %v41_v12 = vld [vmem:[%s650_s2 + $0x28] sm:$0xff]  ;;  %107 = vperm.xlu0 %392, %v43_v11   ;;  %v57_v15 = vld [vmem:[%s648_s0 + $0x18] sm:$0xff]  ;;  %v42_v16 = vld [vmem:[%s650_s2 + $0x30] sm:$0xff] }
   0x9   :  { %97 = vperm.xlu1 %393, %v41_v12   ;;  %v40_v17 = vld [vmem:[%s650_s2 + $0x20] sm:$0xff]  ;;  %v56_v18 = vld [vmem:[%s648_s0 + $0x10] sm:$0xff]  ;;  %v55_v19 = vld [vmem:[%s648_s0 + $0x8] sm:$0xff] }
   0xa   :  { %363 = vmatpush.xpose.msk.msra.mxu3 %vm110_vm0, %v67_v2  ;;  %362 = vmatpush.xpose.msk.msra.mxu2 %vm110_vm0, %v67_v2  ;;  %v37_v20 = vld [vmem:[%s650_s2 + $0x8] sm:$0xff]  ;;  %v36_v21 = vld [vmem:[%s650_s2] sm:$0xff]  ;;  %v31_v23 = vld [vmem:[%s649_s1 + $0x18] sm:$0xff] }
   0xb   :  { %333 = vmatpush.xpose.msk.msra.mxu0 %vm110_vm0, %v67_v2  ;;  %v54_v22 = vld [vmem:[%s648_s0] sm:$0xff]  ;;  %v29_v24 = vld [vmem:[%s649_s1 + $0x8] sm:$0xff]  ;;  %v49_v27 = vld [vmem:[%s652_s4 + $0x10] sm:$0xff] }
   0xc   :  { %v48_v25 = vld [vmem:[%s652_s4 + $0x8] sm:$0xff]  ;;  %v28_v26 = vld [vmem:[%s649_s1] sm:$0xff]  ;;  %v39_v28 = vld [vmem:[%s650_s2 + $0x18] sm:$0xff] }
   0xd   :  { %87 = vperm.xlu2 %394, %v39_v28   ;;  %v32_v29 = vld [vmem:[%s649_s1 + $0x20] sm:$0xff]  ;;  %v30_v30 = vld [vmem:[%s649_s1 + $0x10] sm:$0xff]  ;;  %v51_v32 = vld [vmem:[%s653_s5 + $0x8] sm:$0xff] }
   0xe   :  { %365 = vmatpush.xpose.msk.msra.mxu3 %vm110_vm0, %v66_v3  ;;  %364 = vmatpush.xpose.msk.msra.mxu2 %vm110_vm0, %v66_v3  ;;  %v38_v31 = vld [vmem:[%s650_s2 + $0x10] sm:$0xff]  ;;  %v33_v34 = vld [vmem:[%s649_s1 + $0x28] sm:$0xff]  ;;  %v47_v35 = vld [vmem:[%s652_s4] sm:$0xff] }
   0xf   :  { %334 = vmatpush.xpose.msk.msra.mxu0 %vm110_vm0, %v66_v3  ;;  %v52_v33 = vld [vmem:[%s653_s5 + $0x10] sm:$0xff]  ;;  %v50_v37 = vld [vmem:[%s653_s5] sm:$0xff]  ;;  %v35_v38 = vld [vmem:[%s649_s1 + $0x38] sm:$0xff] }
  0x10   :  { %102 = vperm.xlu0 %392, %v42_v16   ;;  %v34_v36 = vld [vmem:[%s649_s1 + $0x30] sm:$0xff] }
  0x11   :  { %92 = vperm.xlu1 %393, %v40_v17  }
  0x12   :  { %367 = vmatpush.xpose.msk.msra.mxu3 %vm110_vm0, %v65_v4  ;;  %366 = vmatpush.xpose.msk.msra.mxu2 %vm110_vm0, %v65_v4 }
  0x13   :  { %335 = vmatpush.xpose.msk.msra.mxu0 %vm110_vm0, %v65_v4 }
  0x15   :  { %82 = vperm.xlu2 %394, %v38_v31  }
  0x16   :  { %369 = vmatpush.xpose.msk.msra.mxu3 %vm110_vm0, %v64_v5  ;;  %368 = vmatpush.xpose.msk.msra.mxu2 %vm110_vm0, %v64_v5 }
  0x17   :  { %336 = vmatpush.xpose.msk.msra.mxu0 %vm110_vm0, %v64_v5 }
  0x18   :  { %77 = vperm.xlu0 %392, %v37_v20  }
  0x19   :  { %72 = vperm.xlu1 %393, %v36_v21  }
  0x1a   :  { %371 = vmatpush.xpose.msk.msra.mxu3 %vm110_vm0, %v63_v6  ;;  %370 = vmatpush.xpose.msk.msra.mxu2 %vm110_vm0, %v63_v6 }
  0x1b   :  { %337 = vmatpush.xpose.msk.msra.mxu0 %vm110_vm0, %v63_v6 }
  0x1d   :  { %234 = vperm.xlu2 %394, %v47_v35   ;;  %v312_v35 = vstv %s654_s6 }
  0x1e   :  { %373 = vmatpush.xpose.msk.msra.mxu3 %vm110_vm0, %v62_v7  ;;  %372 = vmatpush.xpose.msk.msra.mxu2 %vm110_vm0, %v62_v7 }
  0x1f   :  { %338 = vmatpush.xpose.msk.msra.mxu0 %vm110_vm0, %v62_v7  ;;  %v44_v7 = vld [vmem:[%s651_s3] sm:$0xff] }
  0x20   :  { %239 = vperm.xlu0 %392, %v48_v25  }
  0x21   :  { %244 = vperm.xlu1 %393, %v49_v27  }
  0x22   :  { %375 = vmatpush.xpose.msk.msra.mxu3 %vm110_vm0, %v61_v8  ;;  %374 = vmatpush.xpose.msk.msra.mxu2 %vm110_vm0, %v61_v8 }
  0x23   :  { %339 = vmatpush.xpose.msk.msra.mxu0 %vm110_vm0, %v61_v8  ;;  %v45_v8 = vld [vmem:[%s651_s3 + $0x8] sm:$0xff] }
  0x25   :  { %288 = vperm.xlu2 %394, %v50_v37  }
  0x26   :  { %377 = vmatpush.xpose.msk.msra.mxu3 %vm110_vm0, %v60_v9  ;;  %376 = vmatpush.xpose.msk.msra.mxu2 %vm110_vm0, %v60_v9 }
  0x27   :  { %340 = vmatpush.xpose.msk.msra.mxu0 %vm110_vm0, %v60_v9  ;;  %v46_v9 = vld [vmem:[%s651_s3 + $0x10] sm:$0xff] }
  0x28   :  { %293 = vperm.xlu0 %392, %v51_v32  }
  0x29   :  { %298 = vperm.xlu1 %393, %v52_v33  }
  0x2a   :  { %379 = vmatpush.xpose.msk.msra.mxu3 %vm110_vm0, %v59_v10  ;;  %378 = vmatpush.xpose.msk.msra.mxu2 %vm110_vm0, %v59_v10 }
  0x2b   :  { %341 = vmatpush.xpose.msk.msra.mxu0 %vm110_vm0, %v59_v10 }
  0x2e   :  { %381 = vmatpush.xpose.msk.msra.mxu3 %vm110_vm0, %v58_v13  ;;  %380 = vmatpush.xpose.msk.msra.mxu2 %vm110_vm0, %v58_v13 }
  0x2f   :  { %342 = vmatpush.xpose.msk.msra.mxu0 %vm110_vm0, %v58_v13 }
  0x32   :  { %383 = vmatpush.xpose.msk.msra.mxu3 %vm110_vm0, %v57_v15  ;;  %382 = vmatpush.xpose.msk.msra.mxu2 %vm110_vm0, %v57_v15 }
  0x33   :  { %343 = vmatpush.xpose.msk.msra.mxu0 %vm110_vm0, %v57_v15 }
  0x36   :  { %385 = vmatpush.xpose.msk.msra.mxu3 %vm110_vm0, %v56_v18  ;;  %384 = vmatpush.xpose.msk.msra.mxu2 %vm110_vm0, %v56_v18 }
  0x37   :  { %344 = vmatpush.xpose.msk.msra.mxu0 %vm110_vm0, %v56_v18 }
  0x3a   :  { %387 = vmatpush.xpose.msk.msra.mxu3 %vm110_vm0, %v55_v19  ;;  %386 = vmatpush.xpose.msk.msra.mxu2 %vm110_vm0, %v55_v19 }
  0x3b   :  { %345 = vmatpush.xpose.msk.msra.mxu0 %vm110_vm0, %v55_v19 }
  0x3e   :  { %389 = vmatpush.xpose.msk.msra.mxu3 %vm110_vm0, %v54_v22  ;;  %388 = vmatpush.xpose.msk.msra.mxu2 %vm110_vm0, %v54_v22 }
  0x3f   :  { %346 = vmatpush.xpose.msk.msra.mxu0 %vm110_vm0, %v54_v22 }
  0x41   :  { %350 = vmatmul.msk.f32.vlgmr.msra.gmra.mxu3 %vm110_vm0, %v31_v23  ;;  %348 = vmatmul.msk.f32.vlgmr.msra.gmra.mxu2 %vm110_vm0, %v29_v24 }
  0x42   :  { %347 = vmatmul.msk.f32.vlgmr.msra.gmra.mxu0 %vm110_vm0, %v28_v26 }
  0x49   :  { %351 = vmatmul.msk.f32.gmra.mxu3 %vm110_vm0, %v32_v29  ;;  %349 = vmatmul.msk.f32.gmra.mxu2 %vm110_vm0, %v30_v30 }
  0x51   :  { %352 = vmatmul.msk.f32.gmra.mxu3 %vm110_vm0, %v33_v34 }
  0x59   :  { %353 = vmatmul.msk.f32.gmra.mxu3 %vm110_vm0, %v34_v36 }
  0x61   :  { %354 = vmatmul.msk.f32.gmra.mxu3 %vm110_vm0, %v35_v38 }
  0x67   :  { %v88_v46 = vpop.permute.xlu2 %87 }
  0x6f   :  { %v83_v59 = vpop.permute.xlu2 %82 }
  0x77   :  { %v235_v12 = vpop.permute.xlu2 %234 }
  0x7a   :  { %v108_v42 = vpop.permute.xlu0 %107 }
  0x7b   :  { %v98_v43 = vpop.permute.xlu1 %97 }
  0x7f   :  { %v289_v23 = vpop.permute.xlu2 %288 }
  0x82   :  { %v103_v47 = vpop.permute.xlu0 %102 }
  0x83   :  { %v93_v51 = vpop.permute.xlu1 %92 }
  0x8a   :  { %v78_v62 = vpop.permute.xlu0 %77 }
  0x8b   :  { %v73_v2 = vpop.permute.xlu1 %72 }
  0x92   :  { %v240_v11 = vpop.permute.xlu0 %239 }
  0x93   :  { %v245_v15 = vpop.permute.xlu1 %244 }
  0x9a   :  { %v294_v19 = vpop.permute.xlu0 %293 }
  0x9b   :  { %v299_v26 = vpop.permute.xlu1 %298 }
  0xbf   :  { %v200_v63 = vpop.f32.mrf.mxu0 }
  0xc0   :  { %v201_v3 = vadd.f32 %v200_v63, %v73_v2 }
  0xc2   :  { %v224_v6 = vmax.f32 %v201_v3, 0.0 }
  0xc4   :  { %v209_v39 = vpop.f32.mrf.mxu3  ;;  %v203_v45 = vpop.f32.mrf.mxu2 }
  0xc5   :  { %v210_v57 = vadd.f32 %v209_v39, %v88_v46  ;;  %v204_v1 = vadd.f32 %v203_v45, %v78_v62 }
  0xc7   :  { %v227_v0 = vmax.f32 %v210_v57, 0.0  ;;  %v225_v5 = vmax.f32 %v204_v1, 0.0 }
  0xcc   :  { %v212_v40 = vpop.f32.mrf.mxu3  ;;  %v206_v56 = vpop.f32.mrf.mxu2 }
  0xcd   :  { %v213_v54 = vadd.f32 %v212_v40, %v93_v51  ;;  %v207_v61 = vadd.f32 %v206_v56, %v83_v59 }
  0xcf   :  { %v228_v60 = vmax.f32 %v213_v54, 0.0  ;;  %v226_v4 = vmax.f32 %v207_v61, 0.0 }
  0xd4   :  { %v215_v41 = vpop.f32.mrf.mxu3 }
  0xd5   :  { %v216_v52 = vadd.f32 %v215_v41, %v98_v43 }
  0xd7   :  { %v229_v58 = vmax.f32 %v216_v52, 0.0 }
  0xdc   :  { %v218_v44 = vpop.f32.mrf.mxu3 }
  0xdd   :  { %v219_v49 = vadd.f32 %v218_v44, %v103_v47 }
  0xdf   :  { %v230_v55 = vmax.f32 %v219_v49, 0.0 }
  0xe4   :  { %v221_v48 = vpop.f32.mrf.mxu3 }
  0xe5   :  { %v222_v50 = vadd.f32 %v221_v48, %v108_v42 }
  0xe7   :  { %v231_v53 = vmax.f32 %v222_v50, 0.0 }
  0xe9   :  { %265 = vmatpush.msra.mxu1 %v231_v53 }
  0xeb   :  { %266 = vmatpush.msra.mxu1 %v230_v55 }
  0xed   :  { %267 = vmatpush.msra.mxu1 %v229_v58 }
  0xef   :  { %268 = vmatpush.msra.mxu1 %v228_v60 }
  0xf1   :  { %269 = vmatpush.msra.mxu1 %v227_v0 }
  0xf3   :  { %270 = vmatpush.msra.mxu1 %v226_v4 }
  0xf5   :  { %271 = vmatpush.msra.mxu1 %v225_v5 }
  0xf7   :  { %272 = vmatpush.msra.mxu1 %v224_v6 }
  0xf8   :  { %355 = vmatmul.msk.f32.vlgmr.msra.gmra.mxu1 %vm247_vm1, %v44_v7 }
 0x100   :  { %356 = vmatmul.msk.f32.gmra.mxu1 %vm247_vm1, %v45_v8 }
 0x108   :  { %357 = vmatmul.msk.f32.gmra.mxu1 %vm247_vm1, %v46_v9 }
 0x175   :  { %v274_v10 = vpop.f32.mrf.mxu1 }
 0x176   :  { %v275_v16 = vadd.f32 %v274_v10, %v235_v12 }
 0x178   :  { %v283_v18 = vmax.f32 %v275_v16, 0.0 }
 0x17a   :  { %v301_v24 = vmul.f32 %v289_v23, %v283_v18 }
 0x17d   :  { %v277_v13 = vpop.f32.mrf.mxu1 }
 0x17e   :  { %v278_v14 = vadd.f32 %v277_v13, %v240_v11 }
 0x180   :  { %v284_v17 = vmax.f32 %v278_v14, 0.0 }
 0x182   :  { %v302_v21 = vmul.f32 %v294_v19, %v284_v17 }
 0x184   :  { %v304_v27 = vadd.f32 %v302_v21, %v301_v24 }
 0x185   :  { %v280_v20 = vpop.f32.mrf.mxu1 }
 0x186   :  { %v281_v22 = vadd.f32 %v280_v20, %v245_v15 }
 0x188   :  { %v285_v25 = vmax.f32 %v281_v22, 0.0 }
 0x18a   :  { %v303_v28 = vmul.f32 %v299_v26, %v285_v25 }
 0x18c   :  { %v305_v29 = vadd.f32 %v304_v27, %v303_v28 }
 0x18e   :  { %v306_v30 = vrot.slane %v305_v29, 4 }
 0x190   :  { %v307_v31 = vadd.f32 %v306_v30, %v305_v29 }
 0x192   :  { %v308_v32 = vrot.slane %v307_v31, 2 }
 0x194   :  { %v309_v33 = vadd.f32 %v308_v32, %v307_v31 }
 0x196   :  { %v310_v34 = vrot.slane %v309_v33, 1 }
 0x198   :  { %v311_v36 = vadd.f32 %v310_v34, %v309_v33 }
 0x19a   :  { %v313_v37 = vadd.f32 %v312_v35, %v311_v36 }
 0x19c   :  { %314 = vst [vmem:[#allocation3] sm:$0x1] %v313_v37 }
 0x19d   :  { %325 = dma.vmem_to_hbm [thread:$0]  %s321_s10, 16, %s323_s13, [#allocation4]  }
 0x19e   :  { %419 = dma.done.wait [#allocation4], 16  }
 0x19f   :  { %420 = vsyncadd [#allocation4], 4294967280 }
 0x1a0   :  { %330 = vsyncpa [#allocation4], 1 }

</bundles_post_ra>
